<compile_context>
chip_gen: v5e
topology: v5e:2x2
jax: 0.10.0
libtpu: 0.0.40
codegen_flags: <defaults>
</compile_context>

<pallas_src>
import jax
import jax.numpy as jnp
from jax.experimental import pallas as pl
from jax.experimental.pallas import tpu as pltpu


def _make_jacc_kernel(hw_valid, tile_hw, needs_mask):
    """Builds the kernel; hw_valid / tile_hw / needs_mask are static."""

    def kernel(logits_ref, labels_ref, inter_out, card_out):
        # logits_ref: (1, C, T) native dtype -- classes on sublanes, pixels on lanes
        # labels_ref: (1, 1, T) int32
        # inter_out / card_out: (1, C, 1) f32 per-batch partials, resident
        #                       across the pixel-tile (t) grid axis.
        t = pl.program_id(1)
        nt = pl.num_programs(1)

        @pl.when(t == 0)
        def _init():
            inter_out[...] = jnp.zeros_like(inter_out)
            card_out[...] = jnp.zeros_like(card_out)

        x = logits_ref[0].astype(jnp.float32)            # (C, T)
        labels = labels_ref[0]                           # (1, T) int32

        # Per-pixel softmax over the class (sublane) axis.
        m = jnp.max(x, axis=0, keepdims=True)            # (1, T)
        e = jnp.exp(x - m)                               # (C, T)  (EUP)
        denom = jnp.sum(e, axis=0, keepdims=True)        # (1, T)
        probas = e * pl.reciprocal(denom, approx=True)   # 1 recip/pixel (EUP)

        # One-hot via class-index iota compared against the label row.
        class_ids = jax.lax.broadcasted_iota(jnp.int32, x.shape, 0)   # (C, T)
        one_hot = (class_ids == labels).astype(jnp.float32)           # (C, T)

        inter = probas * one_hot                          # (C, T)
        card = probas + one_hot                           # (C, T)

        def _accumulate(inter_v, card_v):
            # Cross-lane reduce per tile (idle XLU), accumulate into the
            # resident (1, C, 1) output blocks; no lane-wide scratch stores.
            inter_out[...] += jnp.sum(inter_v, axis=-1, keepdims=True)[None, :, :]
            card_out[...] += jnp.sum(card_v, axis=-1, keepdims=True)[None, :, :]

        if needs_mask:
            is_last = t == nt - 1

            @pl.when(jnp.logical_not(is_last))
            def _acc_full():
                _accumulate(inter, card)

            @pl.when(is_last)
            def _acc_tail():
                # Out-of-bounds block contents are unspecified (may be NaN/Inf)
                # -> select with where, never multiply-by-zero.
                pix = t * tile_hw + jax.lax.broadcasted_iota(
                    jnp.int32, (1, tile_hw), 1)
                valid = pix < hw_valid                           # (1, T)
                _accumulate(jnp.where(valid, inter, 0.0),
                            jnp.where(valid, card, 0.0))
        else:
            _accumulate(inter, card)

    return kernel


def _round_up(a, m):
    return (a + m - 1) // m * m


def jaccard_loss_pallas(logits, target, class_weights=None, eps=1e-07,
                        max_tile_hw=65536):
    """logits: [B, C, H, W] float, target: [B, H, W] int -> scalar loss."""
    # TODO(synk): class_weights path omitted (module default is None; the
    # original PyTorch weighting broadcast [C] * [1,C,1,1] is also buggy).
    # TODO(synk): small-C sublane packing ((B, k*C, HW/k) reshape) not
    # implemented; flagged "measure first" in the review.
    B, C, H, W = logits.shape
    HW = H * W

    # Native NCHW kept: contiguous reshapes only, no extra HBM pass.
    x = logits.reshape(B, C, HW)                         # native dtype
    labels = target.reshape(B, 1, HW).astype(jnp.int32)

    # Pick a large, lane-aligned pixel tile, capped by a VMEM byte budget:
    # double-buffered logits + labels blocks plus ~6 live f32 (C,T) temporaries.
    itemsize = jnp.dtype(x.dtype).itemsize
    vmem_budget = 16 * 1024 * 1024
    bytes_per_px = C * (2 * itemsize + 6 * 4) + 2 * 4
    cap = max(128, (vmem_budget // bytes_per_px) // 128 * 128)
    tile_hw = min(max_tile_hw, cap, _round_up(HW, 128))
    n_tiles = pl.cdiv(HW, tile_hw)
    needs_mask = (HW % tile_hw) != 0     # only the last tile can be partial

    kernel = _make_jacc_kernel(HW, tile_hw, needs_mask)

    inter_p, card_p = pl.pallas_call(
        kernel,
        out_shape=(
            jax.ShapeDtypeStruct((B, C, 1), jnp.float32),
            jax.ShapeDtypeStruct((B, C, 1), jnp.float32),
        ),
        grid_spec=pltpu.PrefetchScalarGridSpec(
            num_scalar_prefetch=0,
            grid=(B, n_tiles),
            in_specs=[
                pl.BlockSpec((1, C, tile_hw), lambda b, t: (b, 0, t)),
                pl.BlockSpec((1, 1, tile_hw), lambda b, t: (b, 0, t)),
            ],
            out_specs=[
                pl.BlockSpec((1, C, 1), lambda b, t: (b, 0, 0)),
                pl.BlockSpec((1, C, 1), lambda b, t: (b, 0, 0)),
            ],
        ),
        compiler_params=pltpu.CompilerParams(
            # Batch axis "parallel" -> v7x can shard it across both
            # TensorCores; reduction (pixel-tile) axis stays "arbitrary".
            dimension_semantics=("parallel", "arbitrary"),
            vmem_limit_bytes=48 * 1024 * 1024,
        ),
    )(x, labels)

    # Tiny epilogue: sum per-batch partials, then the scalar Jaccard formula.
    intersection = jnp.sum(inter_p[:, :, 0], axis=0)     # (C,)
    cardinality = jnp.sum(card_p[:, :, 0], axis=0)       # (C,)
    union = cardinality - intersection
    jacc = jnp.mean(intersection / (union + eps))
    return 1.0 - jacc


def _jaccard_loss_ref(logits, target, eps=1e-07):
    """Pure-JAX reference mirroring the PyTorch implementation."""
    C = logits.shape[1]
    one_hot = jax.nn.one_hot(target, C, dtype=jnp.float32)         # [B,H,W,C]
    one_hot = jnp.transpose(one_hot, (0, 3, 1, 2))                 # [B,C,H,W]
    probas = jax.nn.softmax(logits.astype(jnp.float32), axis=1)
    intersection = jnp.sum(probas * one_hot, axis=(0, 2, 3))
    cardinality = jnp.sum(probas + one_hot, axis=(0, 2, 3))
    union = cardinality - intersection
    return 1.0 - jnp.mean(intersection / (union + eps))


if __name__ == "__main__":
    key = jax.random.PRNGKey(0)
    k1, k2, k3, k4, k5, k6 = jax.random.split(key, 6)

    # Case 1: module-sized example (B=2, C=4, 16x16), evenly tiled path.
    B, C, H, W = 2, 4, 16, 16
    logits = jax.random.normal(k1, (B, C, H, W), dtype=jnp.float32)
    target = jax.random.randint(k2, (B, H, W), 0, C, dtype=jnp.int32)
    loss = jax.block_until_ready(jaccard_loss_pallas(logits, target))
    ref = jax.block_until_ready(_jaccard_loss_ref(logits, target))
    assert jnp.allclose(loss, ref, atol=1e-3, rtol=1e-3), (loss, ref)

    # Case 2: non-128-divisible spatial size exercises the masked tail
    # (single tile, no wrapper padding copy).
    B2, C2, H2, W2 = 2, 4, 10, 10
    logits2 = jax.random.normal(k3, (B2, C2, H2, W2), dtype=jnp.float32)
    target2 = jax.random.randint(k4, (B2, H2, W2), 0, C2, dtype=jnp.int32)
    loss2 = jax.block_until_ready(jaccard_loss_pallas(logits2, target2))
    ref2 = jax.block_until_ready(_jaccard_loss_ref(logits2, target2))
    assert jnp.allclose(loss2, ref2, atol=1e-3, rtol=1e-3), (loss2, ref2)

    # Case 3: multi-tile grid with a partial last tile (forced small tile)
    # exercises the pl.when-gated mask on the last pixel tile only.
    B3, C3, H3, W3 = 2, 4, 33, 33
    logits3 = jax.random.normal(k5, (B3, C3, H3, W3), dtype=jnp.float32)
    target3 = jax.random.randint(k6, (B3, H3, W3), 0, C3, dtype=jnp.int32)
    loss3 = jax.block_until_ready(
        jaccard_loss_pallas(logits3, target3, max_tile_hw=256))
    ref3 = jax.block_until_ready(_jaccard_loss_ref(logits3, target3))
    assert jnp.allclose(loss3, ref3, atol=1e-3, rtol=1e-3), (loss3, ref3)

    print("KERNEL_OK")
</pallas_src>

<mosaic_0001>
module attributes {stable_mosaic.version = 11 : i64} {
  func.func @kernel(%arg0: i32, %arg1: i32, %arg2: memref<1x4x256xf32, #tpu.memory_space<vmem>>, %arg3: memref<1x1x256xi32, #tpu.memory_space<vmem>>, %arg4: memref<1x4x1xf32, #tpu.memory_space<vmem>>, %arg5: memref<1x4x1xf32, #tpu.memory_space<vmem>>) attributes {dimension_semantics = [#tpu.dimension_semantics<parallel>, #tpu.dimension_semantics<arbitrary>], iteration_bounds = array<i64: 2, 1>, scalar_prefetch = 0 : i64, scratch_operands = 0 : i64, tpu.core_type = #tpu.core_type<tc>, window_params = [{transform_indices = @transform_0, window_bounds = array<i64: 1, 4, 256>}, {transform_indices = @transform_1, window_bounds = array<i64: 1, 1, 256>}, {transform_indices = @transform_2, window_bounds = array<i64: 1, 4, 1>}, {transform_indices = @transform_3, window_bounds = array<i64: 1, 4, 1>}]} {
    %c0_i32 = arith.constant 0 : i32
    %0 = arith.cmpi eq, %arg1, %c0_i32 : i32
    %1 = arith.extui %0 : i1 to i32
    %c0_i32_0 = arith.constant 0 : i32
    %2 = arith.cmpi ne, %1, %c0_i32_0 : i32
    scf.if %2 {
      %cst_21 = arith.constant 0.000000e+00 : f32
      %36 = vector.broadcast %cst_21 : f32 to vector<1x4x1xf32>
      %c0_22 = arith.constant 0 : index
      %c0_23 = arith.constant 0 : index
      %c0_24 = arith.constant 0 : index
      %37 = vector.load %arg4[%c0_22, %c0_23, %c0_24] : memref<1x4x1xf32, #tpu.memory_space<vmem>>, vector<1x4x1xf32>
      tpu.vector_store %arg4[%c0_22, %c0_23, %c0_24], %36 {strides = array<i32>} : memref<1x4x1xf32, #tpu.memory_space<vmem>>, vector<1x4x1xf32>,
      %cst_25 = arith.constant 0.000000e+00 : f32
      %38 = vector.broadcast %cst_25 : f32 to vector<1x4x1xf32>
      %c0_26 = arith.constant 0 : index
      %c0_27 = arith.constant 0 : index
      %c0_28 = arith.constant 0 : index
      %39 = vector.load %arg5[%c0_26, %c0_27, %c0_28] : memref<1x4x1xf32, #tpu.memory_space<vmem>>, vector<1x4x1xf32>
      tpu.vector_store %arg5[%c0_26, %c0_27, %c0_28], %38 {strides = array<i32>} : memref<1x4x1xf32, #tpu.memory_space<vmem>>, vector<1x4x1xf32>,
    } else {
    }
    %c0 = arith.constant 0 : index
    %c0_1 = arith.constant 0 : index
    %c0_2 = arith.constant 0 : index
    %3 = vector.load %arg2[%c0, %c0_1, %c0_2] : memref<1x4x256xf32, #tpu.memory_space<vmem>>, vector<1x4x256xf32>
    %4 = vector.shape_cast %3 : vector<1x4x256xf32> to vector<4x256xf32>
    %c0_3 = arith.constant 0 : index
    %c0_4 = arith.constant 0 : index
    %c0_5 = arith.constant 0 : index
    %5 = vector.load %arg3[%c0_3, %c0_4, %c0_5] : memref<1x1x256xi32, #tpu.memory_space<vmem>>, vector<1x1x256xi32>
    %6 = vector.shape_cast %5 : vector<1x1x256xi32> to vector<1x256xi32>
    %cst = arith.constant dense<0xFF800000> : vector<256xf32>
    %7 = vector.multi_reduction <maximumf>, %4, %cst [0] : vector<4x256xf32> to vector<256xf32>
    %8 = vector.shape_cast %7 : vector<256xf32> to vector<1x256xf32>
    %9 = vector.broadcast %8 : vector<1x256xf32> to vector<4x256xf32>
    %10 = arith.subf %4, %9 : vector<4x256xf32>
    %11 = math.exp %10 : vector<4x256xf32>
    %cst_6 = arith.constant dense<0.000000e+00> : vector<256xf32>
    %12 = vector.multi_reduction <add>, %11, %cst_6 [0] : vector<4x256xf32> to vector<256xf32>
    %13 = vector.shape_cast %12 : vector<256xf32> to vector<1x256xf32>
    %14 = tpu.reciprocal %13 {approx = true} : vector<1x256xf32> -> vector<1x256xf32>
    %15 = vector.broadcast %14 : vector<1x256xf32> to vector<4x256xf32>
    %16 = arith.mulf %11, %15 : vector<4x256xf32>
    %17 = tpu.iota {dimensions = array<i32: 0>} : vector<4x256xi32>
    %18 = vector.broadcast %6 : vector<1x256xi32> to vector<4x256xi32>
    %19 = arith.cmpi eq, %17, %18 : vector<4x256xi32>
    %20 = arith.extui %19 : vector<4x256xi1> to vector<4x256xi32>
    %21 = arith.sitofp %20 : vector<4x256xi32> to vector<4x256xf32>
    %22 = arith.mulf %16, %21 : vector<4x256xf32>
    %23 = arith.addf %16, %21 : vector<4x256xf32>
    %c0_7 = arith.constant 0 : index
    %c0_8 = arith.constant 0 : index
    %c0_9 = arith.constant 0 : index
    %24 = vector.load %arg4[%c0_7, %c0_8, %c0_9] : memref<1x4x1xf32, #tpu.memory_space<vmem>>, vector<1x4x1xf32>
    %cst_10 = arith.constant dense<0.000000e+00> : vector<4xf32>
    %25 = vector.multi_reduction <add>, %22, %cst_10 [1] : vector<4x256xf32> to vector<4xf32>
    %26 = vector.shape_cast %25 : vector<4xf32> to vector<4x1xf32>
    %27 = vector.shape_cast %26 : vector<4x1xf32> to vector<1x4x1xf32>
    %28 = arith.addf %24, %27 : vector<1x4x1xf32>
    %c0_11 = arith.constant 0 : index
    %c0_12 = arith.constant 0 : index
    %c0_13 = arith.constant 0 : index
    %29 = vector.load %arg4[%c0_11, %c0_12, %c0_13] : memref<1x4x1xf32, #tpu.memory_space<vmem>>, vector<1x4x1xf32>
    tpu.vector_store %arg4[%c0_11, %c0_12, %c0_13], %28 {strides = array<i32>} : memref<1x4x1xf32, #tpu.memory_space<vmem>>, vector<1x4x1xf32>,
    %c0_14 = arith.constant 0 : index
    %c0_15 = arith.constant 0 : index
    %c0_16 = arith.constant 0 : index
    %30 = vector.load %arg5[%c0_14, %c0_15, %c0_16] : memref<1x4x1xf32, #tpu.memory_space<vmem>>, vector<1x4x1xf32>
    %cst_17 = arith.constant dense<0.000000e+00> : vector<4xf32>
    %31 = vector.multi_reduction <add>, %23, %cst_17 [1] : vector<4x256xf32> to vector<4xf32>
    %32 = vector.shape_cast %31 : vector<4xf32> to vector<4x1xf32>
    %33 = vector.shape_cast %32 : vector<4x1xf32> to vector<1x4x1xf32>
    %34 = arith.addf %30, %33 : vector<1x4x1xf32>
    %c0_18 = arith.constant 0 : index
    %c0_19 = arith.constant 0 : index
    %c0_20 = arith.constant 0 : index
    %35 = vector.load %arg5[%c0_18, %c0_19, %c0_20] : memref<1x4x1xf32, #tpu.memory_space<vmem>>, vector<1x4x1xf32>
    tpu.vector_store %arg5[%c0_18, %c0_19, %c0_20], %34 {strides = array<i32>} : memref<1x4x1xf32, #tpu.memory_space<vmem>>, vector<1x4x1xf32>,
    return
  }
  func.func @transform_0(%arg0: i32, %arg1: i32) -> (i32, i32, i32) {
    %c0_i32 = arith.constant 0 : i32
    %c0_i32_0 = arith.constant 0 : i32
    return %arg0, %c0_i32, %arg1 : i32, i32, i32
  }
  func.func @transform_1(%arg0: i32, %arg1: i32) -> (i32, i32, i32) {
    %c0_i32 = arith.constant 0 : i32
    %c0_i32_0 = arith.constant 0 : i32
    return %arg0, %c0_i32, %arg1 : i32, i32, i32
  }
  func.func @transform_2(%arg0: i32, %arg1: i32) -> (i32, i32, i32) {
    %c0_i32 = arith.constant 0 : i32
    %c0_i32_0 = arith.constant 0 : i32
    %c0_i32_1 = arith.constant 0 : i32
    return %arg0, %c0_i32, %c0_i32_0 : i32, i32, i32
  }
  func.func @transform_3(%arg0: i32, %arg1: i32) -> (i32, i32, i32) {
    %c0_i32 = arith.constant 0 : i32
    %c0_i32_0 = arith.constant 0 : i32
    %c0_i32_1 = arith.constant 0 : i32
    return %arg0, %c0_i32, %c0_i32_0 : i32, i32, i32
  }
}

</mosaic_0001>

<bundles_post_ra>
// kernel: tpu_custom_call.1
= control target key start
LH: loop header
LB: loop body
LE: loop exit
PB: predicated region body
PF: predicated region fallthrough
CT: control target
= control target key end

     0   :  { %9 = vsyncpa [#allocation3], 0  ;;  %s861_s0 = inlined_call_operand.hbm [shape: f32[2,4,256], index: 0, kind: input, shape index: {}]   ;;  %s862_s1 = inlined_call_operand.hbm [shape: s32[2,1,256], index: 1, kind: input, shape index: {}]   ;;  %s863_s2 = inlined_call_operand.vmem [shape: f32[2,4,1], index: 2, kind: output, shape index: {0}]   ;;  %s864_s3 = inlined_call_operand.vmem [shape: f32[2,4,1], index: 3, kind: output, shape index: {1}]  }
   0x1   :  { %11 = vsyncpa [#allocation3 + $0x1], 0 }
   0x2   :  { %12 = vsyncpa [#allocation5], 0 }
   0x3   :  { %14 = vsyncpa [#allocation5 + $0x1], 0  ;;  %s728_s12 = smov 0   ;;  %s730_s13 = smov 0  }
   0x4   :  { %s732_s14 = smov 0   ;;  %s734_s15 = smov 0  }
   0x5   :  { %s736_s16 = smov 0   ;;  %s738_s17 = smov 0  }
   0x6 LB: > { %s505_s18 = sadd.s32 4294967295, %s705_s17   ;;  %s32_s19 = sadd.s32 1, %s701_s16  ;;  %s705_s17 = sphi %s738_s17, %s20_s17   ;;  %s701_s16 = sphi %s736_s16, %s872_s16   ;;  %s697_s15 = sphi %s734_s15, %s871_s15   ;;  %s693_s14 = sphi %s732_s14, %s870_s14   ;;  %s689_s13 = sphi %s730_s13, %s869_s13   ;;  %s685_s12 = sphi %s728_s12, %s868_s12  }
   0x7   : > { %p34_p0 = scmp.ge.s32.totalorder %s32_s19, 2  ;;  %s41_s20 = sadd.s32 1, %s693_s14 }
   0x8   : > { %p48_p1 = scmp.ne.s32.totalorder %s693_s14, %s689_s13  ;;  %p49_p2 = scmp.eq.s32.totalorder %s705_s17, 0 }
   0x9   : > { %s874_s19 = smov (%p34_p0, %s32_s19), 0  ;;  %p54_p4 = scmp.ne.s32.totalorder %s689_s13, %s685_s12 }
   0xa   : > { %p764_p3 = por %p49_p2, %p48_p1  ;;  %s36_s22 = ssub.s32 %s701_s16, %s874_s19 }
   0xb   : > { %p55_p5 = scmp.eq.s32.totalorder %s505_s18, 0  ;;  %p39_p6 = scmp.eq.s32.totalorder %s36_s22, 0 }
   0xc   : > { %p535_p8 = scmp.lt.s32.totalorder %s705_s17, 2  ;;  %s158_s25 = sand.u32 1, %s693_s14  }
   0xd   : > { %p771_p7 = por %p55_p5, %p54_p4  ;;  %s523_s26 = sshll.u32 %s701_s16, 3 }
   0xe   : > { %s777_s24 = scalar_select %p39_p6, %s693_s14, %s41_s20  }
   0xf   : > { %s509_s27 = sshll.u32 %s158_s25, 3  ;;  %s169_s30 = scalar_lea.hbm %s861_s0, %s523_s26 }
  0x10   : > { %s171_s4 = sshll.u32 %s169_s30, 4  ;;  %s162_s5 = scalar_lea.vmem [#allocation2], %s509_s27  ;;  %s172_s4 = int_to_ptr.hbm [resolvable:$true] %s171_s4 }
  0x11   : > { %s173_s6 = sshll.u32 %s162_s5, 4  ;;  %p786_p9 = pnand %p535_p8, %p764_p3  ;;  %s174_s6 = int_to_ptr.vmem [resolvable:$true] %s173_s6 }
  0x12   : > { %p514_p10 = scmp.ge.s32.totalorder %s705_s17, 1  ;;  %p199_p11 = scmp.lt.s32.totalorder %s705_s17, 3 }
  0x13   : > { %s512_s8 = sshll.u32 %s158_s25, 1  ;;  %s159_s9 = scalar_lea.sflag [#allocation3], %s158_s25 }
  0x14   : > { %531 = dma.hbm_to_vmem [thread:$0]  (!%p786_p9), %s172_s4, 128, %s174_s6, %s159_s9  }
  0x15   : > { %p200_p12 = pnand %p514_p10, %p199_p11  ;;  %s513_s10 = sshll.u32 %s701_s16, 1 }
  0x16   : > { %s184_s11 = scalar_lea.vmem [#allocation4], %s512_s8  ;;  %s190_s21 = scalar_lea.hbm %s862_s1, %s513_s10 }
  0x17   : > { %s194_s12 = sshll.u32 %s184_s11, 4  ;;  %s192_s22 = sshll.u32 %s190_s21, 4  ;;  %s195_s12 = int_to_ptr.vmem [resolvable:$true] %s194_s12  ;;  %s193_s22 = int_to_ptr.hbm [resolvable:$true] %s192_s22 }
  0x18   : > { %s181_s26 = scalar_lea.sflag [#allocation5], %s158_s25  ;;  %203 = sbr.rel (%p200_p12) target bundleno = 243 (0xf3), region = 28 }
  0x19   : > { %534 = dma.hbm_to_vmem [thread:$0]  (!%p786_p9), %s193_s22, 32, %s195_s12, %s181_s26  }
  0x1a   : > { %s205_s27 = sand.u32 (!%p200_p12), 1, %s689_s13  }
  0x1b   : > { %s515_s28 = sshll.u32 (!%p200_p12), %s205_s27, 3  ;;  %s206_s29 = scalar_lea.sflag (!%p200_p12), [#allocation3], %s205_s27 }
  0x1c   : > { %s209_s30 = scalar_lea.vmem (!%p200_p12), [#allocation2], %s515_s28 }
  0x1d   : > { %676 = dma.done.wait (%p771_p7), %s206_s29, 128  }
  0x1e   : > { %678 = vsyncadd (%p771_p7), %s206_s29, 4294967168  ;;  %s516_s4 = sshll.u32 %s205_s27, 1  ;;  %s216_s5 = scalar_lea.sflag [#allocation5], %s205_s27 }
  0x1f   : > { %s805_s6 = scalar_lea.vmem [#allocation4], %s516_s4 }
  0x20   : > { %680 = dma.done.wait (%p771_p7), %s216_s5, 32  }
  0x21   : > { %682 = vsyncadd (%p771_p7), %s216_s5, 4294967264  ;;  %v268_v0 = vld [vmem:[%s209_s30] sm:$0xff]  ;;  %vm276_vm0 = vcmask 1043456   ;;  %p253_p13 = scmp.lt.s32.totalorder %s697_s15, 1  ;;  %v327_v32 = vlaneseq  ;;  %v269_v33 = vld [vmem:[%s805_s6] sm:$0x3] }
  0x22   : > { %271 = vst [vmem:[#allocation1] ss:$2 sm:$0xff] %v268_v0  ;;  %v330_v39 = vperm.slane %v269_v33, 1  ;;  %v329_v42 = vperm.slane %v269_v33, 0  ;;  %vm265_vm2 = vcmask 3072   ;;  %v707_v43 = vmov 0.0  }
  0x23   : > { %s876_s15 = smov (!%p253_p13, %s697_s15), 1  ;;  %v328_v38 = vshrl.u32 %v327_v32, 7 }
  0x24   : > { %s517_s23 = sshll.u32 %s876_s15, 2 }
  0x25   : > { %vm332_vm1 = vcmp.eq.s32.totalorder %v328_v38, %v330_v39  ;;  %s825_s8 = scalar_lea.vmem %s863_s2, %s517_s23  ;;  %vm331_vm3 = vcmp.eq.s32.totalorder %v328_v38, %v329_v42  ;;  %s260_s10 = scalar_lea.vmem %s864_s3, %s517_s23 }
  0x26   : > { %v520_v44 = vsel %vm332_vm1, 1.0, %v707_v43  ;;  %266 = vst.msk [vmem:[%s825_s8] sm:$0xf] %vm265_vm2, %v707_v43  ;;  %v519_v48 = vsel %vm331_vm3, 1.0, %v707_v43 }
  0x27   : > { %v339_v46 = vrot.slane %v520_v44, 4  ;;  %267 = vst.msk [vmem:[%s260_s10] sm:$0xf] %vm265_vm2, %v707_v43 }
  0x29   : > { %v272_v1 = vld.sshfl [vmem:[#allocation1] sm:$0xff pattern:$0x75316420]  ;;  %v273_v2 = vld.sshfl [vmem:[#allocation1 + $0x8] sm:$0xff pattern:$0x75316420]  ;;  %v340_v51 = vsel %vm276_vm0, %v519_v48, %v339_v46 }
  0x2a   : > { %v277_v3 = vsel %vm276_vm0, %v272_v1, -inf  ;;  %v284_v4 = vsel %vm276_vm0, %v273_v2, -inf }
  0x2b   : > { %v278_v5 = vrot.slane %v277_v3, 4  ;;  %v285_v6 = vrot.slane %v284_v4, 4 }
  0x2d   : > { %v279_v7 = vmax.f32 %v277_v3, %v278_v5  ;;  %v286_v8 = vmax.f32 %v284_v4, %v285_v6  ;;  %v344_v1 = vld [vmem:[%s825_s8] sm:$0xf] }
  0x2e   : > { %v359_v4 = vld [vmem:[%s260_s10] sm:$0xf] }
  0x2f   : > { %v280_v9 = vrot.slane %v279_v7, 2  ;;  %v287_v10 = vrot.slane %v286_v8, 2 }
  0x31   : > { %v281_v11 = vmax.f32 %v279_v7, %v280_v9  ;;  %v288_v12 = vmax.f32 %v286_v8, %v287_v10 }
  0x33   : > { %v282_v13 = vrot.slane %v281_v11, 1  ;;  %v289_v14 = vrot.slane %v288_v12, 1 }
  0x35   : > { %v283_v15 = vmax.f32 %v281_v11, %v282_v13  ;;  %v290_v16 = vmax.f32 %v288_v12, %v289_v14 }
  0x37   : > { %v293_v17 = vrot.slane %v290_v16, 4 }
  0x39   : > { %v294_v18 = vsel %vm276_vm0, %v283_v15, %v293_v17 }
  0x3a   : > { %v296_v19 = vsub.f32 %v268_v0, %v294_v18 }
  0x3c   : > { %v297_v20 = vmul.f32 1.442695, %v296_v19 }
  0x3e   : > { %585 = vpow2.f32 %v297_v20 }
  0x44   : > { %v586_v21 = vpop.eup %585 }
  0x45   : > { %300 = vst [vmem:[#allocation1] ss:$2 sm:$0xff] %v586_v21 }
  0x4c   : > { %v301_v22 = vld.sshfl [vmem:[#allocation1] sm:$0xff pattern:$0x75316420]  ;;  %v302_v23 = vld.sshfl [vmem:[#allocation1 + $0x8] sm:$0xff pattern:$0x75316420] }
  0x4d   : > { %v305_v24 = vsel %vm276_vm0, %v301_v22, 0.0  ;;  %v312_v25 = vsel %vm276_vm0, %v302_v23, 0.0 }
  0x4e   : > { %v306_v26 = vrot.slane %v305_v24, 4  ;;  %v313_v27 = vrot.slane %v312_v25, 4 }
  0x50   : > { %v307_v28 = vadd.f32 %v306_v26, %v305_v24  ;;  %v314_v29 = vadd.f32 %v313_v27, %v312_v25 }
  0x52   : > { %v308_v30 = vrot.slane %v307_v28, 2  ;;  %v315_v31 = vrot.slane %v314_v29, 2 }
  0x54   : > { %v309_v34 = vadd.f32 %v308_v30, %v307_v28  ;;  %v316_v35 = vadd.f32 %v315_v31, %v314_v29 }
  0x56   : > { %v310_v36 = vrot.slane %v309_v34, 1  ;;  %v317_v37 = vrot.slane %v316_v35, 1 }
  0x58   : > { %v311_v40 = vadd.f32 %v310_v36, %v309_v34  ;;  %v318_v41 = vadd.f32 %v317_v37, %v316_v35 }
  0x5a   : > { %587 = vrcp.f32 %v311_v40 }
  0x5b   : > { %589 = vrcp.f32 %v318_v41 }
  0x60   : > { %v588_v45 = vpop.eup %587 }
  0x61   : > { %v590_v47 = vpop.eup %589 }
  0x62   : > { %v323_v49 = vrot.slane %v590_v47, 4 }
  0x64   : > { %v324_v50 = vsel %vm276_vm0, %v588_v45, %v323_v49 }
  0x65   : > { %v326_v52 = vmul.f32 %v586_v21, %v324_v50 }
  0x67   : > { %v342_v53 = vmul.f32 %v340_v51, %v326_v52  ;;  %v343_v54 = vadd.f32 %v340_v51, %v326_v52 }
  0x69   : > { %346 = vst [vmem:[#allocation1] ss:$2 sm:$0xff] %v342_v53 }
  0x70   : > { %v347_v55 = vld.sshfl [vmem:[#allocation1] sm:$0xff pattern:$0x75316420]  ;;  %v348_v56 = vld.sshfl [vmem:[#allocation1 + $0x8] sm:$0xff pattern:$0x75316420] }
  0x71   : > { %v351_v57 = vsel %vm276_vm0, %v347_v55, 0.0  ;;  %v352_v58 = vsel %vm276_vm0, %v348_v56, 0.0  ;;  %361 = vst [vmem:[#allocation1] ss:$2 sm:$0xff] %v343_v54 }
  0x72   : > { %v353_v59 = vadd.f32 %v352_v58, %v351_v57 }
  0x74   : > { %354 = vadd.xlane.f32.xlu0 %v353_v59 }
  0x78   : > { %v362_v60 = vld.sshfl [vmem:[#allocation1] sm:$0xff pattern:$0x75316420]  ;;  %v363_v61 = vld.sshfl [vmem:[#allocation1 + $0x8] sm:$0xff pattern:$0x75316420] }
  0x79   : > { %v366_v62 = vsel %vm276_vm0, %v362_v60, 0.0  ;;  %v367_v63 = vsel %vm276_vm0, %v363_v61, 0.0 }
  0x7a   : > { %v368_v0 = vadd.f32 %v367_v63, %v366_v62 }
  0x7c   : > { %369 = vadd.xlane.f32.xlu0 %v368_v0 }
  0xe7   : > { %v355_v2 = vpop.xlane.xlu0 %354 }
  0xe8   : > { %v356_v3 = vadd.f32 %v355_v2, %v344_v1 }
  0xea   : > { %358 = vst.msk [vmem:[%s825_s8] sm:$0xf] %vm265_vm2, %v356_v3 }
  0xef   : > { %v370_v5 = vpop.xlane.xlu0 %369 }
  0xf0   : > { %v371_v6 = vadd.f32 %v370_v5, %v359_v4 }
  0xf2   : > { %372 = vst.msk [vmem:[%s260_s10] sm:$0xf] %vm265_vm2, %v371_v6 }
  0xf3 PF: > { %s20_s17 = sadd.s32 1, %s705_s17   ;;  %s868_s12 = smov %s689_s13 }
  0xf4   : > { %p17_p0 = scmp.ge.s32.totalorder %s20_s17, 4   ;;  %s869_s13 = smov %s693_s14 }
  0xf5   : > { %s870_s14 = smov %s777_s24  ;;  %s871_s15 = smov %s701_s16 }
  0xf6   : > { %s872_s16 = smov %s874_s19  ;;  %19 = sbr.rel (!%p17_p0) target bundleno = 6 (0x6), region = 97 }
  0xfb   :  { %406 = vsyncpa [#allocation3], 1 }
  0xfc   :  { %408 = vsyncpa [#allocation3 + $0x1], 1 }
  0xfd   :  { %409 = vsyncpa [#allocation5], 1 }
  0xfe   :  { %411 = vsyncpa [#allocation5 + $0x1], 1 }

</bundles_post_ra>
